<compile_context>
chip_gen: v7x
topology: tpu7x:2x2x1
jax: 0.10.0
libtpu: 0.0.40
codegen_flags: <defaults>
</compile_context>

<pallas_src>
import jax
import jax.numpy as jnp
from jax.experimental import pallas as pl
from jax.experimental.pallas import tpu as pltpu

IN_DIM = 16
OUT_DIM = 8
H1, H2, H3 = 128, 128, 64

TB_CAP = 512   # max batch-tile rows per grid step (multiple of 8)


def _round_up(x, m):
    return ((x + m - 1) // m) * m


def _choose_tb(b_pad8):
    """Batch tile: multiple of 8, capped at TB_CAP, and >=2 grid steps when
    the batch allows it (so v7x megacore can use both TensorCores)."""
    if b_pad8 <= 8:
        return 8
    half = _round_up((b_pad8 + 1) // 2, 8)
    return min(TB_CAP, half)


def _leaky_relu(v):
    # nn.LeakyReLU default negative_slope = 0.01.
    # max(v, 0.01*v) == where(v > 0, v, 0.01*v) bit-for-bit, one VPU op cheaper.
    return jnp.maximum(v, 0.01 * v)


def policy_mlp_kernel(x_ref,
                      w1_ref, b1_ref,
                      w2_ref, b2_ref,
                      w3_ref, b3_ref,
                      w4_ref, b4_ref,
                      out_ref):
    # x tile: (tb, 16) bf16.  Weights: bf16 at natural shapes.  Biases: f32.
    h = jnp.dot(x_ref[...], w1_ref[...],
                preferred_element_type=jnp.float32) + b1_ref[...]
    h = _leaky_relu(h)

    h = jnp.dot(h.astype(jnp.bfloat16), w2_ref[...],
                preferred_element_type=jnp.float32) + b2_ref[...]
    h = _leaky_relu(h)

    h = jnp.dot(h.astype(jnp.bfloat16), w3_ref[...],
                preferred_element_type=jnp.float32) + b3_ref[...]
    h = _leaky_relu(h)

    h = jnp.dot(h.astype(jnp.bfloat16), w4_ref[...],
                preferred_element_type=jnp.float32) + b4_ref[...]
    out_ref[...] = jnp.tanh(h)


@jax.jit
def policy_forward(x, kparams):
    """x: (..., in_dim) -> (B, out_dim), mirroring torch forward().

    kparams: dict with w1..w4 bf16 at natural shapes and b1..b4 as (1, n) f32.
    """
    x = x.reshape(-1, IN_DIM)
    B = x.shape[0]

    b_pad = _round_up(B, 8)            # sublane-align the batch only
    tb = _choose_tb(b_pad)
    grid = (pl.cdiv(b_pad, tb),)       # last block may be partial; Pallas masks it

    x_in = x.astype(jnp.bfloat16)      # kernel casts to bf16 anyway -> halve DMA
    if b_pad != B:
        x_in = jnp.pad(x_in, ((0, b_pad - B), (0, 0)))

    const = lambda i: (0, 0)           # weights/biases resident across grid steps

    out = pl.pallas_call(
        policy_mlp_kernel,
        out_shape=jax.ShapeDtypeStruct((b_pad, OUT_DIM), jnp.float32),
        grid=grid,
        in_specs=[
            pl.BlockSpec((tb, IN_DIM), lambda i: (i, 0)),   # x tile
            pl.BlockSpec((IN_DIM, H1), const),              # w1 (16, 128)
            pl.BlockSpec((1, H1), const),                   # b1
            pl.BlockSpec((H1, H2), const),                  # w2 (128, 128)
            pl.BlockSpec((1, H2), const),                   # b2
            pl.BlockSpec((H2, H3), const),                  # w3 (128, 64)
            pl.BlockSpec((1, H3), const),                   # b3
            pl.BlockSpec((H3, OUT_DIM), const),             # w4 (64, 8)
            pl.BlockSpec((1, OUT_DIM), const),              # b4
        ],
        out_specs=pl.BlockSpec((tb, OUT_DIM), lambda i: (i, 0)),
        compiler_params=pltpu.CompilerParams(
            dimension_semantics=("parallel",)),
    )(x_in,
      kparams["w1"], kparams["b1"],
      kparams["w2"], kparams["b2"],
      kparams["w3"], kparams["b3"],
      kparams["w4"], kparams["b4"])

    return out[:B]


def init_params(key):
    """Deterministic init mirroring torch.nn.Linear's U(-1/sqrt(fan_in), ...).

    Weights stored transposed vs torch (shape (in, out)) so the kernel
    computes h = x @ W + b directly.
    """
    dims = [(IN_DIM, H1), (H1, H2), (H2, H3), (H3, OUT_DIM)]
    params = {}
    keys = jax.random.split(key, 2 * len(dims))
    for i, (fan_in, fan_out) in enumerate(dims):
        bound = 1.0 / jnp.sqrt(fan_in)
        params[f"w{i + 1}"] = jax.random.uniform(
            keys[2 * i], (fan_in, fan_out),
            minval=-bound, maxval=bound, dtype=jnp.float32)
        params[f"b{i + 1}"] = jax.random.uniform(
            keys[2 * i + 1], (1, fan_out),
            minval=-bound, maxval=bound, dtype=jnp.float32)
    return params


def prep_params(params):
    """Kernel-ready params: bf16 weights for the MXU, f32 biases, no padding."""
    out = {}
    for i in range(1, 5):
        out[f"w{i}"] = params[f"w{i}"].astype(jnp.bfloat16)
        out[f"b{i}"] = params[f"b{i}"]
    return out


# TODO(synk): log_forward (Normal.rsample + tanh log-prob correction) and the
# Adam/loss training path are not kernelized; only forward() is implemented.

if __name__ == "__main__":
    key = jax.random.PRNGKey(0)
    pkey, xkey = jax.random.split(key)

    params = init_params(pkey)
    kparams = prep_params(params)

    # Small case (batch=2); forward() reshapes any input to (-1, in_dim).
    B = 2
    x = jax.random.normal(xkey, (B, IN_DIM), dtype=jnp.float32)
    out = policy_forward(x, kparams)
    jax.block_until_ready(out)
    assert out.shape == (B, OUT_DIM)

    # Reference 1: exact mimic of the kernel math (bf16 MXU inputs, f32 acc).
    def ref_bf16(x, p):
        h = x.astype(jnp.bfloat16)
        for i in range(1, 4):
            h = jnp.dot(h, p[f"w{i}"].astype(jnp.bfloat16),
                        preferred_element_type=jnp.float32) + p[f"b{i}"]
            h = jnp.maximum(h, 0.01 * h).astype(jnp.bfloat16)
        h = jnp.dot(h, p["w4"].astype(jnp.bfloat16),
                    preferred_element_type=jnp.float32) + p["b4"]
        return jnp.tanh(h)

    # Reference 2: pure f32 math (the original torch semantics).
    def ref_f32(x, p):
        h = x
        for i in range(1, 4):
            h = h @ p[f"w{i}"] + p[f"b{i}"]
            h = jnp.maximum(h, 0.01 * h)
        return jnp.tanh(h @ p["w4"] + p["b4"])

    assert jnp.allclose(out, ref_bf16(x, params), atol=2e-3, rtol=2e-3)
    assert jnp.allclose(out, ref_f32(x, params), atol=3e-2, rtol=3e-2)

    # Larger batch: exercises batch padding (2999 -> 3000), multi-step grid
    # (tb=512 -> 6 steps) and a partial last block.
    B2 = 2999
    x2 = jax.random.normal(jax.random.PRNGKey(1), (B2, IN_DIM), dtype=jnp.float32)
    out2 = policy_forward(x2, kparams)
    jax.block_until_ready(out2)
    assert out2.shape == (B2, OUT_DIM)
    assert jnp.allclose(out2, ref_f32(x2, params), atol=3e-2, rtol=3e-2)

    print("KERNEL_OK")
</pallas_src>

<mosaic_0001>
module attributes {stable_mosaic.version = 11 : i64} {
  func.func @policy_mlp_kernel(%arg0: i32, %arg1: memref<8x16xbf16, #tpu.memory_space<vmem>>, %arg2: memref<16x128xbf16, #tpu.memory_space<vmem>>, %arg3: memref<1x128xf32, #tpu.memory_space<vmem>>, %arg4: memref<128x128xbf16, #tpu.memory_space<vmem>>, %arg5: memref<1x128xf32, #tpu.memory_space<vmem>>, %arg6: memref<128x64xbf16, #tpu.memory_space<vmem>>, %arg7: memref<1x64xf32, #tpu.memory_space<vmem>>, %arg8: memref<64x8xbf16, #tpu.memory_space<vmem>>, %arg9: memref<1x8xf32, #tpu.memory_space<vmem>>, %arg10: memref<8x8xf32, #tpu.memory_space<vmem>>) attributes {dimension_semantics = [#tpu.dimension_semantics<parallel>], iteration_bounds = array<i64: 1>, scalar_prefetch = 0 : i64, scratch_operands = 0 : i64, tpu.core_type = #tpu.core_type<tc>, window_params = [{transform_indices = @transform_0, window_bounds = array<i64: 8, 16>}, {pipeline_mode = #tpu.pipeline_mode<synchronous>, transform_indices = @transform_1, window_bounds = array<i64: 16, 128>}, {pipeline_mode = #tpu.pipeline_mode<synchronous>, transform_indices = @transform_2, window_bounds = array<i64: 1, 128>}, {pipeline_mode = #tpu.pipeline_mode<synchronous>, transform_indices = @transform_3, window_bounds = array<i64: 128, 128>}, {pipeline_mode = #tpu.pipeline_mode<synchronous>, transform_indices = @transform_4, window_bounds = array<i64: 1, 128>}, {pipeline_mode = #tpu.pipeline_mode<synchronous>, transform_indices = @transform_5, window_bounds = array<i64: 128, 64>}, {pipeline_mode = #tpu.pipeline_mode<synchronous>, transform_indices = @transform_6, window_bounds = array<i64: 1, 64>}, {pipeline_mode = #tpu.pipeline_mode<synchronous>, transform_indices = @transform_7, window_bounds = array<i64: 64, 8>}, {pipeline_mode = #tpu.pipeline_mode<synchronous>, transform_indices = @transform_8, window_bounds = array<i64: 1, 8>}, {transform_indices = @transform_9, window_bounds = array<i64: 8, 8>}]} {
    %c0 = arith.constant 0 : index
    %c0_0 = arith.constant 0 : index
    %0 = vector.load %arg1[%c0, %c0_0] : memref<8x16xbf16, #tpu.memory_space<vmem>>, vector<8x16xbf16>
    %c0_1 = arith.constant 0 : index
    %c0_2 = arith.constant 0 : index
    %1 = vector.load %arg2[%c0_1, %c0_2] : memref<16x128xbf16, #tpu.memory_space<vmem>>, vector<16x128xbf16>
    %cst = arith.constant dense<0.000000e+00> : vector<8x128xf32>
    %2 = tpu.matmul %0, %1, %cst {dimension_numbers = #tpu.dot_dimension_numbers<[1], [0], [0], [1], [0, 0, 1, 1], [], []>} : vector<8x16xbf16>, vector<16x128xbf16>, vector<8x128xf32> -> vector<8x128xf32>
    %c0_3 = arith.constant 0 : index
    %c0_4 = arith.constant 0 : index
    %3 = vector.load %arg3[%c0_3, %c0_4] : memref<1x128xf32, #tpu.memory_space<vmem>>, vector<1x128xf32>
    %4 = vector.broadcast %3 : vector<1x128xf32> to vector<8x128xf32>
    %5 = arith.addf %2, %4 : vector<8x128xf32>
    %cst_5 = arith.constant 0.00999999977 : f32
    %6 = vector.broadcast %cst_5 : f32 to vector<8x128xf32>
    %7 = arith.mulf %6, %5 : vector<8x128xf32>
    %8 = arith.maximumf %5, %7 : vector<8x128xf32>
    %9 = arith.truncf %8 : vector<8x128xf32> to vector<8x128xbf16>
    %c0_6 = arith.constant 0 : index
    %c0_7 = arith.constant 0 : index
    %10 = vector.load %arg4[%c0_6, %c0_7] : memref<128x128xbf16, #tpu.memory_space<vmem>>, vector<128x128xbf16>
    %cst_8 = arith.constant dense<0.000000e+00> : vector<8x128xf32>
    %11 = tpu.matmul %9, %10, %cst_8 {dimension_numbers = #tpu.dot_dimension_numbers<[1], [0], [0], [1], [0, 0, 1, 1], [], []>} : vector<8x128xbf16>, vector<128x128xbf16>, vector<8x128xf32> -> vector<8x128xf32>
    %c0_9 = arith.constant 0 : index
    %c0_10 = arith.constant 0 : index
    %12 = vector.load %arg5[%c0_9, %c0_10] : memref<1x128xf32, #tpu.memory_space<vmem>>, vector<1x128xf32>
    %13 = vector.broadcast %12 : vector<1x128xf32> to vector<8x128xf32>
    %14 = arith.addf %11, %13 : vector<8x128xf32>
    %cst_11 = arith.constant 0.00999999977 : f32
    %15 = vector.broadcast %cst_11 : f32 to vector<8x128xf32>
    %16 = arith.mulf %15, %14 : vector<8x128xf32>
    %17 = arith.maximumf %14, %16 : vector<8x128xf32>
    %18 = arith.truncf %17 : vector<8x128xf32> to vector<8x128xbf16>
    %c0_12 = arith.constant 0 : index
    %c0_13 = arith.constant 0 : index
    %19 = vector.load %arg6[%c0_12, %c0_13] : memref<128x64xbf16, #tpu.memory_space<vmem>>, vector<128x64xbf16>
    %cst_14 = arith.constant dense<0.000000e+00> : vector<8x64xf32>
    %20 = tpu.matmul %18, %19, %cst_14 {dimension_numbers = #tpu.dot_dimension_numbers<[1], [0], [0], [1], [0, 0, 1, 1], [], []>} : vector<8x128xbf16>, vector<128x64xbf16>, vector<8x64xf32> -> vector<8x64xf32>
    %c0_15 = arith.constant 0 : index
    %c0_16 = arith.constant 0 : index
    %21 = vector.load %arg7[%c0_15, %c0_16] : memref<1x64xf32, #tpu.memory_space<vmem>>, vector<1x64xf32>
    %22 = vector.broadcast %21 : vector<1x64xf32> to vector<8x64xf32>
    %23 = arith.addf %20, %22 : vector<8x64xf32>
    %cst_17 = arith.constant 0.00999999977 : f32
    %24 = vector.broadcast %cst_17 : f32 to vector<8x64xf32>
    %25 = arith.mulf %24, %23 : vector<8x64xf32>
    %26 = arith.maximumf %23, %25 : vector<8x64xf32>
    %27 = arith.truncf %26 : vector<8x64xf32> to vector<8x64xbf16>
    %c0_18 = arith.constant 0 : index
    %c0_19 = arith.constant 0 : index
    %28 = vector.load %arg8[%c0_18, %c0_19] : memref<64x8xbf16, #tpu.memory_space<vmem>>, vector<64x8xbf16>
    %cst_20 = arith.constant dense<0.000000e+00> : vector<8x8xf32>
    %29 = tpu.matmul %27, %28, %cst_20 {dimension_numbers = #tpu.dot_dimension_numbers<[1], [0], [0], [1], [0, 0, 1, 1], [], []>} : vector<8x64xbf16>, vector<64x8xbf16>, vector<8x8xf32> -> vector<8x8xf32>
    %c0_21 = arith.constant 0 : index
    %c0_22 = arith.constant 0 : index
    %30 = vector.load %arg9[%c0_21, %c0_22] : memref<1x8xf32, #tpu.memory_space<vmem>>, vector<1x8xf32>
    %31 = vector.broadcast %30 : vector<1x8xf32> to vector<8x8xf32>
    %32 = arith.addf %29, %31 : vector<8x8xf32>
    %33 = math.tanh %32 : vector<8x8xf32>
    %c0_23 = arith.constant 0 : index
    %c0_24 = arith.constant 0 : index
    %34 = vector.load %arg10[%c0_23, %c0_24] : memref<8x8xf32, #tpu.memory_space<vmem>>, vector<8x8xf32>
    tpu.vector_store %arg10[%c0_23, %c0_24], %33 {strides = array<i32>} : memref<8x8xf32, #tpu.memory_space<vmem>>, vector<8x8xf32>,
    return
  }
  func.func @transform_0(%arg0: i32) -> (i32, i32) {
    %c0_i32 = arith.constant 0 : i32
    %c0_i32_0 = arith.constant 0 : i32
    return %arg0, %c0_i32 : i32, i32
  }
  func.func @transform_1(%arg0: i32) -> (i32, i32) {
    %c0_i32 = arith.constant 0 : i32
    %c0_i32_0 = arith.constant 0 : i32
    %c0_i32_1 = arith.constant 0 : i32
    return %c0_i32, %c0_i32_0 : i32, i32
  }
  func.func @transform_2(%arg0: i32) -> (i32, i32) {
    %c0_i32 = arith.constant 0 : i32
    %c0_i32_0 = arith.constant 0 : i32
    %c0_i32_1 = arith.constant 0 : i32
    return %c0_i32, %c0_i32_0 : i32, i32
  }
  func.func @transform_3(%arg0: i32) -> (i32, i32) {
    %c0_i32 = arith.constant 0 : i32
    %c0_i32_0 = arith.constant 0 : i32
    %c0_i32_1 = arith.constant 0 : i32
    return %c0_i32, %c0_i32_0 : i32, i32
  }
  func.func @transform_4(%arg0: i32) -> (i32, i32) {
    %c0_i32 = arith.constant 0 : i32
    %c0_i32_0 = arith.constant 0 : i32
    %c0_i32_1 = arith.constant 0 : i32
    return %c0_i32, %c0_i32_0 : i32, i32
  }
  func.func @transform_5(%arg0: i32) -> (i32, i32) {
    %c0_i32 = arith.constant 0 : i32
    %c0_i32_0 = arith.constant 0 : i32
    %c0_i32_1 = arith.constant 0 : i32
    return %c0_i32, %c0_i32_0 : i32, i32
  }
  func.func @transform_6(%arg0: i32) -> (i32, i32) {
    %c0_i32 = arith.constant 0 : i32
    %c0_i32_0 = arith.constant 0 : i32
    %c0_i32_1 = arith.constant 0 : i32
    return %c0_i32, %c0_i32_0 : i32, i32
  }
  func.func @transform_7(%arg0: i32) -> (i32, i32) {
    %c0_i32 = arith.constant 0 : i32
    %c0_i32_0 = arith.constant 0 : i32
    %c0_i32_1 = arith.constant 0 : i32
    return %c0_i32, %c0_i32_0 : i32, i32
  }
  func.func @transform_8(%arg0: i32) -> (i32, i32) {
    %c0_i32 = arith.constant 0 : i32
    %c0_i32_0 = arith.constant 0 : i32
    %c0_i32_1 = arith.constant 0 : i32
    return %c0_i32, %c0_i32_0 : i32, i32
  }
  func.func @transform_9(%arg0: i32) -> (i32, i32) {
    %c0_i32 = arith.constant 0 : i32
    %c0_i32_0 = arith.constant 0 : i32
    return %arg0, %c0_i32 : i32, i32
  }
}

</mosaic_0001>

<bundles_post_ra>
// kernel: policy_forward.1
= control target key start
LH: loop header
LB: loop body
LE: loop exit
PB: predicated region body
PF: predicated region fallthrough
CT: control target
= control target key end

     0   :  { %v549_v0 = vmov 0.0   ;;  %vm550_vm0 = vmmov 0   ;;  %vm49_vm1 = vcmask 130048   ;;  %vm363_vm2 = vcmask 523264   ;;  %s711_s1 = inlined_call_operand.vmem [shape: bf16[16,128], index: 1, kind: input, shape index: {}]   ;;  %s712_s0 = inlined_call_operand.vmem [shape: bf16[8,16], index: 0, kind: input, shape index: {}]   ;;  %s713_s3 = inlined_call_operand.vmem [shape: bf16[128,128], index: 3, kind: input, shape index: {}]   ;;  %s714_s5 = inlined_call_operand.vmem [shape: bf16[128,64], index: 5, kind: input, shape index: {}]   ;;  %s715_s2 = inlined_call_operand.vmem [shape: f32[1,128], index: 2, kind: input, shape index: {}]   ;;  %s716_s7 = inlined_call_operand.vmem [shape: bf16[64,8], index: 7, kind: input, shape index: {}]   ;;  %s717_s4 = inlined_call_operand.vmem [shape: f32[1,128], index: 4, kind: input, shape index: {}]   ;;  %s718_s6 = inlined_call_operand.vmem [shape: f32[1,64], index: 6, kind: input, shape index: {}]   ;;  %s719_s8 = inlined_call_operand.vmem [shape: f32[1,8], index: 8, kind: input, shape index: {}]   ;;  %s720_s9 = inlined_call_operand.vmem [shape: f32[8,8], index: 9, kind: output, shape index: {}]  }
   0x1   :  { %466 = vmatprep.subr.bf16.mxu0 %v549_v0  ;;  %v526_v1 = vld [vmem:[%s711_s1] sm:$0xff]   ;;  %468 = vmatprep.mubr.msk.bf16.mxu0 %vm550_vm0, %v549_v0  ;;  %v528_v4 = vld [vmem:[%s713_s3 + $0x8] sm:$0xff]   ;;  %v529_v5 = vld [vmem:[%s713_s3 + $0x10] sm:$0xff]   ;;  %vm408_vm3 = vcmask 64512  }
   0x2   :  { %v33_v2 = vld [vmem:[%s712_s0] sm:$0xf]  ;;  %472 = vmatprep.subr.bf16.mxu1 %v549_v0  ;;  %488 = vmatprep.mubr.msk.bf16.mxu1 %vm550_vm0, %v549_v0  ;;  %v530_v6 = vld [vmem:[%s713_s3 + $0x18] sm:$0xff]   ;;  %v532_v8 = vld [vmem:[%s713_s3 + $0x28] sm:$0xff]  }
   0x3   :  { %467 = vmatpush3.bf16.msra.mxu0 %v526_v1  ;;  %v527_v3 = vld [vmem:[%s713_s3] sm:$0xff]   ;;  %v533_v9 = vld [vmem:[%s713_s3 + $0x30] sm:$0xff]   ;;  %v534_v10 = vld [vmem:[%s713_s3 + $0x38] sm:$0xff]  }
   0x4   :  { %492 = vmatprep.subr.bf16.mxu0 %v549_v0  ;;  %473 = vmatpush3.bf16.msra.mxu1 %v527_v3  ;;  %v531_v7 = vld [vmem:[%s713_s3 + $0x20] sm:$0xff]   ;;  %v536_v12 = vld [vmem:[%s714_s5 + $0x8] sm:$0xff]   ;;  %v537_v13 = vld [vmem:[%s714_s5 + $0x10] sm:$0xff]  }
   0x5   :  { %474 = vmatprep.subr.bf16.mxu1 %v549_v0  ;;  %v535_v11 = vld [vmem:[%s714_s5] sm:$0xff]   ;;  %v538_v14 = vld [vmem:[%s714_s5 + $0x18] sm:$0xff]   ;;  %v540_v16 = vld [vmem:[%s714_s5 + $0x28] sm:$0xff]  }
   0x6   :  { %469 = vmatmul.mubr.msk.bf16.vlgmr.msra.gmra.mrb[0].mxu0 %vm49_vm1, %v33_v2  ;;  %v539_v15 = vld [vmem:[%s714_s5 + $0x20] sm:$0xff]   ;;  %v541_v26 = vld [vmem:[%s714_s5 + $0x30] sm:$0xff]   ;;  %v542_v27 = vld [vmem:[%s714_s5 + $0x38] sm:$0xff]  }
   0x7   :  { %508 = vmatprep.mubr.msk.bf16.mxu0 %vm550_vm0, %v549_v0  ;;  %493 = vmatpush3.bf16.msra.mxu0 %v535_v11  ;;  %v414_v17 = vld [vmem:[%s715_s2] ss:$0 sm:$0xff]  ;;  %v544_v29 = vld [vmem:[%s716_s7 + $0x8] sm:$0xff]   ;;  %v545_v39 = vld [vmem:[%s716_s7 + $0x10] sm:$0xff]  }
   0x8   :  { %475 = vmatpush3.bf16.msra.mxu1 %v528_v4  ;;  %494 = vmatprep.subr.bf16.mxu0 %v549_v0  ;;  %v543_v28 = vld [vmem:[%s716_s7] sm:$0xff]   ;;  %v546_v40 = vld [vmem:[%s716_s7 + $0x18] sm:$0xff]  }
   0x9   :  { %476 = vmatprep.subr.bf16.mxu1 %v549_v0  ;;  %v417_v30 = vld [vmem:[%s717_s4] ss:$0 sm:$0xff] }
   0xa   :  { %v426_v41 = vld [vmem:[%s718_s6] ss:$0 sm:$0xff] }
   0xb   :  { %495 = vmatpush3.bf16.msra.mxu0 %v536_v12  ;;  %v435_v50 = vld [vmem:[%s719_s8] ss:$0 sm:$0xff] }
   0xc   :  { %477 = vmatpush3.bf16.msra.mxu1 %v529_v5  ;;  %496 = vmatprep.subr.bf16.mxu0 %v549_v0 }
   0xd   :  { %478 = vmatprep.subr.bf16.mxu1 %v549_v0 }
   0xf   :  { %497 = vmatpush3.bf16.msra.mxu0 %v537_v13 }
  0x10   :  { %479 = vmatpush3.bf16.msra.mxu1 %v530_v6  ;;  %498 = vmatprep.subr.bf16.mxu0 %v549_v0 }
  0x11   :  { %480 = vmatprep.subr.bf16.mxu1 %v549_v0 }
  0x13   :  { %499 = vmatpush3.bf16.msra.mxu0 %v538_v14 }
  0x14   :  { %481 = vmatpush3.bf16.msra.mxu1 %v531_v7  ;;  %500 = vmatprep.subr.bf16.mxu0 %v549_v0 }
  0x15   :  { %482 = vmatprep.subr.bf16.mxu1 %v549_v0 }
  0x17   :  { %501 = vmatpush3.bf16.msra.mxu0 %v539_v15 }
  0x18   :  { %483 = vmatpush3.bf16.msra.mxu1 %v532_v8  ;;  %502 = vmatprep.subr.bf16.mxu0 %v549_v0 }
  0x19   :  { %484 = vmatprep.subr.bf16.mxu1 %v549_v0 }
  0x1b   :  { %503 = vmatpush3.bf16.msra.mxu0 %v540_v16 }
  0x1c   :  { %485 = vmatpush3.bf16.msra.mxu1 %v533_v9  ;;  %504 = vmatprep.subr.bf16.mxu0 %v549_v0 }
  0x1d   :  { %486 = vmatprep.subr.bf16.mxu1 %v549_v0 }
  0x1f   :  { %505 = vmatpush3.bf16.msra.mxu0 %v541_v26 }
  0x20   :  { %487 = vmatpush3.bf16.msra.mxu1 %v534_v10  ;;  %506 = vmatprep.subr.bf16.mxu0 %v549_v0 }
  0x21   :  { %512 = vmatprep.subr.bf16.mxu1 %v549_v0 }
  0x23   :  { %507 = vmatpush3.bf16.msra.mxu0 %v542_v27 }
  0xd9   :  { %v87_v18 = vpop.f32.mrb[0].mxu0 }
  0xda   :  { %v88_v19 = vadd.f32 %v414_v17, %v87_v18  ;;  %v470_v20 = vpop.f32.mrb[1].mxu0 }
  0xdb   :  { %v90_v21 = vpop.f32.mrb[2].mxu0 }
  0xdc   :  { %v93_v22 = vmul.f32 0.01, %v88_v19  ;;  %v471_v23 = vpop.f32.mrb[3].mxu0 }
  0xde   :  { %v94_v24 = vmax.f32 %v88_v19, %v93_v22 }
  0xe0   :  { %v95_v25 = vpack.c.bf16 %v94_v24, %v94_v24 }
  0xe2   :  { %489 = vmatmul.mubr.bf16.vlgmr.msra.gmra.mrb[0].mxu1 %v95_v25 }
  0xe3   :  { %520 = vmatprep.mubr.msk.bf16.mxu1 %vm550_vm0, %v549_v0  ;;  %513 = vmatpush3.bf16.msra.mxu1 %v543_v28 }
  0xe4   :  { %514 = vmatprep.subr.bf16.mxu1 %v549_v0 }
  0xe7   :  { %515 = vmatpush3.bf16.msra.mxu1 %v544_v29 }
  0xe8   :  { %516 = vmatprep.subr.bf16.mxu1 %v549_v0 }
  0xeb   :  { %517 = vmatpush3.bf16.msra.mxu1 %v545_v39 }
  0xec   :  { %518 = vmatprep.subr.bf16.mxu1 %v549_v0 }
  0xef   :  { %519 = vmatpush3.bf16.msra.mxu1 %v546_v40 }
 0x1b5   :  { %v201_v31 = vpop.f32.mrb[0].mxu1 }
 0x1b6   :  { %v202_v32 = vadd.f32 %v417_v30, %v201_v31  ;;  %v490_v33 = vpop.f32.mrb[1].mxu1 }
 0x1b7   :  { %v204_v34 = vpop.f32.mrb[2].mxu1 }
 0x1b8   :  { %v207_v35 = vmul.f32 0.01, %v202_v32  ;;  %v491_v36 = vpop.f32.mrb[3].mxu1 }
 0x1ba   :  { %v208_v37 = vmax.f32 %v202_v32, %v207_v35 }
 0x1bc   :  { %v209_v38 = vpack.c.bf16 %v208_v37, %v208_v37 }
 0x1be   :  { %509 = vmatmul.mubr.bf16.vlgmr.msra.gmra.mrb[4].mxu0 %v209_v38 }
 0x291   :  { %v315_v42 = vpop.f32.mrb[4].mxu0 }
 0x292   :  { %v316_v43 = vadd.f32 %v426_v41, %v315_v42  ;;  %v510_v44 = vpop.f32.mrb[5].mxu0 }
 0x293   :  { %v318_v45 = vpop.f32.mrb[6].mxu0 }
 0x294   :  { %v321_v46 = vmul.f32 0.01, %v316_v43  ;;  %v511_v47 = vpop.f32.mrb[7].mxu0 }
 0x296   :  { %v322_v48 = vmax.f32 %v316_v43, %v321_v46 }
 0x298   :  { %v323_v49 = vpack.c.bf16 %v322_v48, %v322_v48 }
 0x29a   :  { %521 = vmatmul.mubr.msk.bf16.vlgmr.msra.gmra.mrb[4].mxu1 %vm363_vm2, %v323_v49 }
 0x36d   :  { %v401_v51 = vpop.f32.mrb[4].mxu1 }
 0x36e   :  { %v402_v52 = vadd.f32 %v435_v50, %v401_v51  ;;  %v522_v53 = vpop.f32.mrb[5].mxu1 }
 0x36f   :  { %v404_v54 = vpop.f32.mrb[6].mxu1 }
 0x370   :  { %547 = vtanh.f32 %v402_v52  ;;  %v523_v55 = vpop.f32.mrb[7].mxu1 }
 0x37a   :  { %v548_v56 = vpop.eup %547 }
 0x37b   :  { %409 = vst.msk [vmem:[%s720_s9] sm:$0xff] %vm408_vm3, %v548_v56 }

</bundles_post_ra>
